<compile_context>
chip_gen: v7x
topology: tpu7x:2x2x1
jax: 0.10.0
libtpu: 0.0.40
codegen_flags: <defaults>
</compile_context>

<pallas_src>
import jax
import jax.numpy as jnp
from jax.experimental import pallas as pl
from jax.experimental.pallas import tpu as pltpu


def _make_ensemble_kernel(inv_n):
    def ensemble_kernel(x_ref, w_ref, bm_ref, o_ref, acc_ref):
        """x_ref: (tb, mb*d_in) (x replicated mb x along K); w_ref: (mb, d_in, tn);
        bm_ref: (1, tn) bias mean; o_ref: (tb, tn); acc_ref: (tb, tn) f32 scratch."""
        m = pl.program_id(2)

        @pl.when(m == 0)
        def _init():
            acc_ref[...] = jnp.zeros_like(acc_ref)

        mb, d_in, tn = w_ref.shape
        # MXU K-fold: sum_m(x @ W_m) == [x | x | ... | x] @ [W_0; W_1; ...; W_{mb-1}].
        # Collapsing (mb, d_in) -> mb*d_in is layout-free because d_in % 8 == 0
        # (wrapper forces mb = 1 otherwise).
        w_flat = w_ref[...].reshape(mb * d_in, tn)
        acc_ref[...] += jnp.dot(
            x_ref[...], w_flat, preferred_element_type=jnp.float32
        )

        @pl.when(m == pl.num_programs(2) - 1)
        def _finalize():
            # mean over the ensemble = (sum_m x @ W_m) / N + mean_m(b_m)
            o_ref[...] = (acc_ref[...] * inv_n + bm_ref[...]).astype(o_ref.dtype)

    return ensemble_kernel


def _pick_tile(dim, candidates):
    for c in candidates:
        if c <= dim and dim % c == 0:
            return c
    return dim


def _vmem_capacity_bytes():
    try:
        return int(pltpu.get_tpu_info().vmem_capacity_bytes)
    except Exception:
        return 64 * 1024 * 1024  # conservative fallback (v7x per-TC VMEM)


def ensemble_forward(x, weights, biases, *, tn=None, tb=None, mb=None,
                     vmem_budget_bytes=None):
    """x: (B, D_in); weights: (N, D_in, D_out); biases: (N, D_out) or (N, 1, D_out).
    Returns mean_m(x @ W_m + b_m): (B, D_out)."""
    n_models, d_in, d_out = weights.shape
    b = x.shape[0]
    w_bytes = jnp.dtype(weights.dtype).itemsize
    x_bytes = jnp.dtype(x.dtype).itemsize

    if vmem_budget_bytes is None:
        # ~75% of per-core VMEM: ~96 MiB on v5e/v6e, ~48 MiB on v7x.
        vmem_budget_bytes = int(0.75 * _vmem_capacity_bytes())

    # ---- tile selection ---------------------------------------------------
    if tb is None:
        tb = _pick_tile(b, (256, 128, 64, 32, 16, 8))       # sublane multiple
    if tn is None:
        tn = _pick_tile(d_out, (512, 384, 256, 128))          # lane-dense
        # v7x has 2 TensorCores: keep >= 2 parallel grid tiles when possible.
        while ((b // tb) * (d_out // tn) < 2 and tn % 2 == 0
               and tn // 2 >= 128 and d_out % (tn // 2) == 0):
            tn //= 2
    if mb is None:
        # Double-buffered weight slab + replicated-x block must fit the budget.
        fixed = (2 * tb * tn * x_bytes          # output blocks
                 + tb * tn * 4                  # f32 accumulator scratch
                 + 2 * 8 * tn * 4               # padded bias-mean block
                 + (2 << 20))                   # headroom
        per_model = 2 * (d_in * tn + tb * d_in) * w_bytes
        avail = max(vmem_budget_bytes - fixed, per_model)
        mb = int(max(1, min(n_models, avail // per_model)))
        while n_models % mb != 0:
            mb -= 1
    if d_in % 8 != 0:
        mb = 1  # (mb, d_in) -> mb*d_in collapse only layout-free if d_in % 8 == 0

    assert b % tb == 0, "B must be divisible by tb (pad the batch)"
    assert d_out % tn == 0, "D_out must be divisible by tn"
    assert n_models % mb == 0, "N must be divisible by mb"

    # ---- wrapper-side prep (tiny, single XLA ops) ---------------------------
    # x replicated mb x along K so the in-kernel matmul folds the model sum.
    x_rep = jnp.tile(x, (1, mb)) if mb > 1 else x                  # (B, mb*d_in)
    # The kernel only ever needs mean_m(b_m): shape (1, D_out), f32.
    bias_mean = jnp.mean(
        biases.reshape(n_models, d_out).astype(jnp.float32), axis=0, keepdims=True)

    grid = (b // tb, d_out // tn, n_models // mb)

    est_vmem = (2 * mb * d_in * tn * w_bytes          # weight slabs (dbl-buffered)
                + 2 * tb * mb * d_in * x_bytes        # replicated-x blocks
                + 2 * tb * tn * x_bytes               # output blocks
                + tb * tn * 4                         # accumulator scratch
                + 2 * 8 * tn * 4)                     # bias-mean block (padded)
    vmem_limit = min(int(0.9 * _vmem_capacity_bytes()),
                     max(int(vmem_budget_bytes), int(1.25 * est_vmem)))

    kernel = _make_ensemble_kernel(1.0 / n_models)

    return pl.pallas_call(
        kernel,
        out_shape=jax.ShapeDtypeStruct((b, d_out), x.dtype),
        grid_spec=pltpu.PrefetchScalarGridSpec(
            num_scalar_prefetch=0,
            grid=grid,
            in_specs=[
                # Replicated x tile: resident across output-tile and model axes.
                pl.BlockSpec((tb, mb * d_in), lambda i, j, m: (i, 0)),
                # mb stacked weight slabs for this (output tile, model block).
                pl.BlockSpec((mb, d_in, tn), lambda i, j, m: (m, 0, j)),
                # Bias mean for this output tile; resident across batch/model axes.
                pl.BlockSpec((1, tn), lambda i, j, m: (0, j)),
            ],
            # Output block index constant over the (last) model axis; only the
            # final pl.when writes it, the f32 scratch holds partial sums.
            out_specs=pl.BlockSpec((tb, tn), lambda i, j, m: (i, j)),
            scratch_shapes=[pltpu.VMEM((tb, tn), jnp.float32)],
        ),
        compiler_params=pltpu.CompilerParams(
            dimension_semantics=("parallel", "parallel", "arbitrary"),
            vmem_limit_bytes=vmem_limit,
        ),
    )(x_rep, weights, bias_mean)


if __name__ == "__main__":
    key = jax.random.PRNGKey(0)
    k_x, k_w, k_b = jax.random.split(key, 3)

    # Lane-dense shapes: D_out multiple of 128 -> unmasked vst output stores.
    N_MODELS, B, D_IN, D_OUT = 4, 8, 128, 256

    x = jax.random.normal(k_x, (B, D_IN), dtype=jnp.float32)
    weights = jax.random.normal(k_w, (N_MODELS, D_IN, D_OUT), dtype=jnp.float32) * 0.1
    biases = jax.random.normal(k_b, (N_MODELS, 1, D_OUT), dtype=jnp.float32) * 0.1

    # tn=128 -> 2 output tiles (both parallel axes exercised); mb=2 -> 2 model
    # blocks, exercising the in-kernel reduction/accumulation path.
    out = ensemble_forward(x, weights, biases, tn=128, mb=2)
    out = jax.block_until_ready(out)

    # Pure-JAX reference of EnsembleModel.forward semantics (per-model preds, mean).
    ref = jnp.mean(
        jnp.einsum("bi,nio->nbo", x, weights,
                   precision=jax.lax.Precision.HIGHEST) + biases,
        axis=0,
    )
    assert out.shape == (B, D_OUT)
    assert jnp.allclose(out, ref, atol=1e-3, rtol=1e-3), "mismatch vs reference"

    print("KERNEL_OK")
</pallas_src>

<mosaic_0001>
module attributes {stable_mosaic.version = 11 : i64} {
  func.func @ensemble_kernel(%arg0: i32, %arg1: i32, %arg2: i32, %arg3: memref<8x256xf32, #tpu.memory_space<vmem>>, %arg4: memref<2x128x128xf32, #tpu.memory_space<vmem>>, %arg5: memref<1x128xf32, #tpu.memory_space<vmem>>, %arg6: memref<8x128xf32, #tpu.memory_space<vmem>>, %arg7: memref<8x128xf32, #tpu.memory_space<vmem>>) attributes {dimension_semantics = [#tpu.dimension_semantics<parallel>, #tpu.dimension_semantics<parallel>, #tpu.dimension_semantics<arbitrary>], iteration_bounds = array<i64: 1, 2, 2>, scalar_prefetch = 0 : i64, scratch_operands = 1 : i64, tpu.core_type = #tpu.core_type<tc>, window_params = [{transform_indices = @transform_0, window_bounds = array<i64: 8, 256>}, {transform_indices = @transform_1, window_bounds = array<i64: 2, 128, 128>}, {transform_indices = @transform_2, window_bounds = array<i64: 1, 128>}, {transform_indices = @transform_3, window_bounds = array<i64: 8, 128>}]} {
    %c0_i32 = arith.constant 0 : i32
    %0 = arith.cmpi eq, %arg2, %c0_i32 : i32
    %1 = arith.extui %0 : i1 to i32
    %c0_i32_0 = arith.constant 0 : i32
    %2 = arith.cmpi ne, %1, %c0_i32_0 : i32
    scf.if %2 {
      %cst_10 = arith.constant 0.000000e+00 : f32
      %13 = vector.broadcast %cst_10 : f32 to vector<8x128xf32>
      %c0_11 = arith.constant 0 : index
      %c0_12 = arith.constant 0 : index
      %14 = vector.load %arg7[%c0_11, %c0_12] : memref<8x128xf32, #tpu.memory_space<vmem>>, vector<8x128xf32>
      tpu.vector_store %arg7[%c0_11, %c0_12], %13 {strides = array<i32>} : memref<8x128xf32, #tpu.memory_space<vmem>>, vector<8x128xf32>,
    } else {
    }
    %c0 = arith.constant 0 : index
    %c0_1 = arith.constant 0 : index
    %c0_2 = arith.constant 0 : index
    %3 = vector.load %arg4[%c0, %c0_1, %c0_2] : memref<2x128x128xf32, #tpu.memory_space<vmem>>, vector<2x128x128xf32>
    %4 = vector.shape_cast %3 : vector<2x128x128xf32> to vector<256x128xf32>
    %c0_3 = arith.constant 0 : index
    %c0_4 = arith.constant 0 : index
    %5 = vector.load %arg7[%c0_3, %c0_4] : memref<8x128xf32, #tpu.memory_space<vmem>>, vector<8x128xf32>
    %c0_5 = arith.constant 0 : index
    %c0_6 = arith.constant 0 : index
    %6 = vector.load %arg3[%c0_5, %c0_6] : memref<8x256xf32, #tpu.memory_space<vmem>>, vector<8x256xf32>
    %cst = arith.constant dense<0.000000e+00> : vector<8x128xf32>
    %7 = tpu.matmul %6, %4, %cst {dimension_numbers = #tpu.dot_dimension_numbers<[1], [0], [0], [1], [0, 0, 1, 1], [], []>} : vector<8x256xf32>, vector<256x128xf32>, vector<8x128xf32> -> vector<8x128xf32>
    %8 = arith.addf %5, %7 : vector<8x128xf32>
    %c0_7 = arith.constant 0 : index
    %c0_8 = arith.constant 0 : index
    %9 = vector.load %arg7[%c0_7, %c0_8] : memref<8x128xf32, #tpu.memory_space<vmem>>, vector<8x128xf32>
    tpu.vector_store %arg7[%c0_7, %c0_8], %8 {strides = array<i32>} : memref<8x128xf32, #tpu.memory_space<vmem>>, vector<8x128xf32>,
    %c1_i32 = arith.constant 1 : i32
    %10 = arith.cmpi eq, %arg2, %c1_i32 : i32
    %11 = arith.extui %10 : i1 to i32
    %c0_i32_9 = arith.constant 0 : i32
    %12 = arith.cmpi ne, %11, %c0_i32_9 : i32
    scf.if %12 {
      %c0_10 = arith.constant 0 : index
      %c0_11 = arith.constant 0 : index
      %13 = vector.load %arg7[%c0_10, %c0_11] : memref<8x128xf32, #tpu.memory_space<vmem>>, vector<8x128xf32>
      %cst_12 = arith.constant 2.500000e-01 : f32
      %14 = vector.broadcast %cst_12 : f32 to vector<8x128xf32>
      %15 = arith.mulf %13, %14 : vector<8x128xf32>
      %c0_13 = arith.constant 0 : index
      %c0_14 = arith.constant 0 : index
      %16 = vector.load %arg5[%c0_13, %c0_14] : memref<1x128xf32, #tpu.memory_space<vmem>>, vector<1x128xf32>
      %17 = vector.broadcast %16 : vector<1x128xf32> to vector<8x128xf32>
      %18 = arith.addf %15, %17 : vector<8x128xf32>
      %c0_15 = arith.constant 0 : index
      %c0_16 = arith.constant 0 : index
      %19 = vector.load %arg6[%c0_15, %c0_16] : memref<8x128xf32, #tpu.memory_space<vmem>>, vector<8x128xf32>
      tpu.vector_store %arg6[%c0_15, %c0_16], %18 {strides = array<i32>} : memref<8x128xf32, #tpu.memory_space<vmem>>, vector<8x128xf32>,
    } else {
    }
    return
  }
  func.func @transform_0(%arg0: i32, %arg1: i32, %arg2: i32) -> (i32, i32) {
    %c0_i32 = arith.constant 0 : i32
    %c0_i32_0 = arith.constant 0 : i32
    return %arg0, %c0_i32 : i32, i32
  }
  func.func @transform_1(%arg0: i32, %arg1: i32, %arg2: i32) -> (i32, i32, i32) {
    %c0_i32 = arith.constant 0 : i32
    %c0_i32_0 = arith.constant 0 : i32
    return %arg2, %c0_i32, %arg1 : i32, i32, i32
  }
  func.func @transform_2(%arg0: i32, %arg1: i32, %arg2: i32) -> (i32, i32) {
    %c0_i32 = arith.constant 0 : i32
    %c0_i32_0 = arith.constant 0 : i32
    return %c0_i32, %arg1 : i32, i32
  }
  func.func @transform_3(%arg0: i32, %arg1: i32, %arg2: i32) -> (i32, i32) {
    %c0_i32 = arith.constant 0 : i32
    return %arg0, %arg1 : i32, i32
  }
}

</mosaic_0001>

<bundles_post_ra>
// kernel: tpu_custom_call.1
= control target key start
LH: loop header
LB: loop body
LE: loop exit
PB: predicated region body
PF: predicated region fallthrough
CT: control target
= control target key end

     0   :  { %s1237_s0 = inlined_call_operand.hbm [shape: f32[8,256], index: 0, kind: input, shape index: {}]   ;;  %s1238_s1 = inlined_call_operand.hbm [shape: f32[4,128,256], index: 1, kind: input, shape index: {}]   ;;  %s1239_s2 = inlined_call_operand.vmem [shape: f32[1,256], index: 2, kind: input, shape index: {}]   ;;  %s1240_s3 = inlined_call_operand.hbm [shape: f32[8,256], index: 3, kind: output, shape index: {}]  }
   0x1   :  { %1252 = sst [smem:[#allocation17_spill]] %s1237_s0 }
   0x2   :  { %8 = vsyncpa [#allocation4], 0 }
   0x3   :  { %9 = vsyncpa [#allocation7], 0 }
   0x4   :  { %11 = vsyncpa [#allocation7 + $0x1], 0 }
   0x5   :  { %12 = vsyncpa [#allocation5], 0 }
   0x6   :  { %14 = vsyncpa [#allocation5 + $0x1], 0  ;;  %s922_s12 = smov 0   ;;  %s924_s13 = smov 0  }
   0x7   :  { %s926_s14 = smov 0   ;;  %s928_s15 = smov 0  }
   0x8   :  { %s930_s16 = smov 0   ;;  %s932_s17 = smov 0  }
   0x9   :  { %s934_s18 = smov 0   ;;  %s936_s19 = smov 0  }
   0xa   :  { %s938_s20 = smov 0   ;;  %s940_s21 = smov 0  }
   0xb   :  { %s942_s22 = smov 0  }
   0xc LB: > { %1253 = sst [smem:[#allocation12_spill]] %s853_s12  ;;  %s504_s23 = sadd.s32 4294967295, %s893_s22   ;;  %s893_s22 = sphi %s942_s22, %s20_s22   ;;  %s889_s21 = sphi %s940_s21, %s1287_s21   ;;  %s885_s20 = sphi %s938_s20, %s1278_s20   ;;  %s881_s19 = sphi %s936_s19, %s1286_s19   ;;  %s877_s18 = sphi %s934_s18, %s1277_s18   ;;  %s873_s17 = sphi %s932_s17, %s1285_s17   ;;  %s869_s16 = sphi %s930_s16, %s1284_s16   ;;  %s865_s15 = sphi %s928_s15, %s1283_s15   ;;  %s861_s14 = sphi %s926_s14, %s1282_s14   ;;  %s857_s13 = sphi %s924_s13, %s1281_s13   ;;  %s853_s12 = sphi %s922_s12, %s1280_s12  }
   0xd   : > { %1254 = sst [smem:[#allocation13_spill]] %s885_s20  ;;  %s505_s24 = sadd.s32 4294967294, %s893_s22  }
   0xe   : > { %p81_p0 = scmp.ne.s32.totalorder %s873_s17, %s869_s16  ;;  %p82_p1 = scmp.eq.s32.totalorder %s893_s22, 0 }
   0xf   : > { %p87_p2 = scmp.ne.s32.totalorder %s869_s16, %s865_s15  ;;  %p982_p3 = scmp.eq.s32.totalorder %s504_s23, 0 }
  0x10   : > { %p987_p4 = por %p82_p1, %p81_p0  ;;  %p138_p5 = scmp.ne.s32.totalorder %s861_s14, %s857_s13 }
  0x11   : > { %s1255_s26 = scalar_select %p982_p3, 1, 0 }
  0x12   : > { %p995_p6 = por %p982_p3, %p87_p2  ;;  %p139_p7 = scmp.eq.s32.totalorder %s504_s23, 3 }
  0x13   : > { %p144_p8 = scmp.ne.s32.totalorder %s857_s13, %s853_s12  ;;  %p145_p9 = scmp.eq.s32.totalorder %s505_s24, 3 }
  0x14   : > { %s1257_s29 = scalar_select %p995_p6, 1, 0 }
  0x15   : > { %p1001_p10 = por %p139_p7, %p138_p5  ;;  %p506_p11 = scmp.ge.s32.totalorder %s893_s22, 1 }
  0x16   : > { %p1006_p12 = por %p145_p9, %p144_p8  ;;  %p152_p13 = scmp.lt.s32.totalorder %s893_s22, 5 }
  0x17   : > { %s1258_s30 = scalar_select %p1001_p10, 1, 0 }
  0x18   : > { %s1259_s4 = scalar_select %p1006_p12, 1, 0 }
  0x19   : > { %p1011_p0 = pnand %p506_p11, %p152_p13  ;;  %s895_s6 = smov [#allocation3]  }
  0x1a   : > { %1260 = sst [smem:[#allocation14_spill]] %s1259_s4  ;;  %s168_s7 = sshll.u32 %s895_s6, 4  ;;  %s169_s7 = int_to_ptr.vmem [resolvable:$true] %s168_s7 }
  0x1b   : > { %s1261_s5 = scalar_select %p1011_p0, 1, 0 }
  0x1c   : > { %p600_p1 = pneg %p1011_p0  ;;  %p613_p2 = scmp.lt.s32.totalorder %s893_s22, 4 }
  0x1d   : > { %s1264_s0 = sld [smem:[#allocation17_spill]] }
  0x1e   : > { %p1020_p5 = pnand %p600_p1, %p982_p3  ;;  %p1026_p7 = pnand %p613_p2, %p987_p4 }
  0x20   : > { %s1263_s9 = scalar_select %p1026_p7, 1, 0 }
  0x21   : > { %p711_p9 = pneg %p1020_p5 }
  0x23   : > { %s709_s15 = scalar_lea.hbm %s1264_s0, 256 }
  0x24   : > { %p710_p8 = scmp.ne.s32.totalorder %s1264_s0, %s709_s15  ;;  %p716_p1 = scmp.lt.u32.totalorder %s709_s15, %s1264_s0 }
  0x26   : > { %p712_p11 = pnand %p711_p9, %p710_p8 }
  0x28   : > { %p713_p13 = pneg %p712_p11 }
  0x2a   : > { %p718_p4 = pnand %p716_p1, %p713_p13 }
  0x2c   : > { %721 = shalt.err (!%p718_p4)
}
  0x2d   : > { %s722_s28 = scalar_lea.vmem %s169_s7, 256  ;;  %p730_p6 = scmp.lt.s32.totalorder %s169_s7, %s169_s7 }
  0x2e   : > { %p723_p2 = scmp.ne.s32.totalorder %s169_s7, %s722_s28  ;;  %p731_p3 = scmp.lt.s32.totalorder %s722_s28, %s722_s28 }
  0x30   : > { %p725_p12 = pnand %p723_p2, %p711_p9  ;;  %p732_p0 = por %p731_p3, %p730_p6 }
  0x32   : > { %p726_p10 = pneg %p725_p12 }
  0x34   : > { %p733_p7 = pnand %p732_p0, %p726_p10 }
  0x36   : > { %736 = shalt.err (!%p733_p7)
}
  0x37   : > { %603 = dma.hbm_to_vmem [thread:$0]  (!%p1020_p5), %s1264_s0, 256, %s169_s7, [#allocation4]  }
  0x38   : > { %s32_s25 = sadd.s32 1, %s885_s20  ;;  %s35_s15 = sadd.s32 1, %s889_s21 }
  0x39   : > { %p33_p12 = scmp.ge.s32.totalorder %s32_s25, 2  ;;  %s179_s23 = sand.u32 1, %s873_s17  }
  0x3a   : > { %s509_s24 = sshll.u32 %s179_s23, 8  ;;  %s524_s6 = sshll.u32 %s885_s20, 6 }
  0x3b   : > { %s1289_s25 = smov (%p33_p12, %s32_s25), 0  ;;  %s1291_s15 = smov (!%p33_p12, %s35_s15), %s889_s21 }
  0x3c   : > { %1265 = sst [smem:[#allocation15_spill]] %s1289_s25  ;;  %s69_s8 = ssub.s32 %s885_s20, %s1289_s25 }
  0x3d   : > { %p37_p3 = scmp.ge.s32.totalorder %s1291_s15, 2  ;;  %s189_s28 = sadd.s32 %s889_s21, %s524_s6 }
  0x3e   : > { %s183_s7 = scalar_lea.vmem [#allocation6], %s509_s24  ;;  %s512_s11 = sshll.u32 %s189_s28, 7 }
  0x3f   : > { %s192_s10 = sshll.u32 %s183_s7, 4  ;;  %s1293_s15 = smov (%p37_p3, %s1291_s15), 0  ;;  %s1058_s10 = int_to_ptr.vmem [resolvable:$true] %s192_s10 }
  0x40   : > { %1266 = sst [smem:[#allocation16_spill]] %s1293_s15  ;;  %s70_s27 = ssub.s32 %s889_s21, %s1293_s15 }
  0x41   : > { %s1065_s12 = scalar_lea.hbm %s1238_s1, %s512_s11  ;;  %s71_s6 = sor.u32 %s70_s27, %s69_s8 }
  0x42   : > { %p126_p6 = scmp.eq.s32.totalorder %s70_s27, 0  ;;  %p72_p10 = scmp.eq.s32.totalorder %s71_s6, 0 }
  0x43   : > { %s1267_s24 = sadd.s32 1, %s861_s14  ;;  %s1268_s25 = sadd.s32 1, %s873_s17 }
  0x44   : > { %s1070_s7 = scalar_select %p126_p6, %s861_s14, %s1267_s24  }
  0x45   : > { %s1075_s28 = scalar_select %p72_p10, %s873_s17, %s1268_s25  }
  0x46   : > { %s1077_s20 = scalar_lea.sflag [#allocation7], %s179_s23  ;;  %s737_s15 = scalar_lea.hbm %s1065_s12, 4096 }
  0x47   : > { %p738_p0 = scmp.ne.s32.totalorder %s1065_s12, %s737_s15  ;;  %p1269_p5 = scmp.ne.s32.totalorder %s1263_s9, 0 }
  0x48   : > { %s742_s27 = scalar_lea.hbm %s1238_s1, 16384  ;;  %p743_p11 = scmp.lt.u32.totalorder %s1065_s12, %s1238_s1 }
  0x49   : > { %p739_p7 = pneg %p1269_p5  ;;  %p744_p13 = scmp.lt.u32.totalorder %s742_s27, %s737_s15 }
  0x4a   : > { %p746_p4 = scmp.lt.u32.totalorder %s737_s15, %s1065_s12 }
  0x4b   : > { %p740_p8 = pnand %p739_p7, %p738_p0  ;;  %p745_p1 = por %p744_p13, %p743_p11 }
  0x4d   : > { %p741_p9 = pneg %p740_p8  ;;  %p747_p2 = por %p746_p4, %p745_p1 }
  0x4f   : > { %p748_p12 = pnand %p747_p2, %p741_p9 }
  0x51   : > { %751 = shalt.err (!%p748_p12)
}
  0x52   : > { %s752_s25 = scalar_lea.vmem %s1058_s10, 4096  ;;  %s896_s23 = smov [#allocation6]  }
  0x53   : > { %p753_p3 = scmp.ne.s32.totalorder %s1058_s10, %s752_s25  ;;  %s757_s6 = sshll.u32 %s896_s23, 4  ;;  %s758_s6 = int_to_ptr.vmem [resolvable:$false] %s757_s6 }
  0x54   : > { %s759_s24 = scalar_lea.vmem %s758_s6, 8192  ;;  %p760_p0 = scmp.lt.s32.totalorder %s1058_s10, %s758_s6 }
  0x55   : > { %p755_p6 = pnand %p753_p3, %p739_p7  ;;  %p761_p8 = scmp.lt.s32.totalorder %s759_s24, %s752_s25 }
  0x57   : > { %p756_p10 = pneg %p755_p6  ;;  %p762_p11 = por %p761_p8, %p760_p0 }
  0x59   : > { %p763_p13 = pnand %p762_p11, %p756_p10 }
  0x5b   : > { %766 = shalt.err (!%p763_p13)
}
  0x5c   : > { %s897_s15 = smov 256   ;;  %s898_s0 = smov 128  }
  0x5d   : > { %s899_s4 = smov 8   ;;  %p1270_p7 = scmp.ne.s32.totalorder %s1261_s5, 0 }
  0x5e   : > { %607 = dma.hbm_to_vmem [thread:$0]  (!%p1269_p5), %s1065_s12, 4096, %s1058_s10, %s1077_s20, %s897_s15, %s898_s0, %s899_s4  }
  0x5f   : > { %210 = sbr.rel (%p1270_p7) target bundleno = 407 (0x197), region = 32  ;;  %p1271_p9 = scmp.ne.s32.totalorder (!%p1270_p7), %s1255_s26, 0 }
  0x66   : > { %840 = dma.done.wait (%p1271_p9), [#allocation4], 256  }
  0x67   : > { %842 = vsyncadd (%p1271_p9), [#allocation4], 4294967040  ;;  %s216_s27 = sand.u32 1, %s869_s16   ;;  %p1272_p1 = scmp.ne.s32.totalorder %s1257_s29, 0 }
  0x68   : > { %s515_s8 = sshll.u32 %s216_s27, 8  ;;  %s217_s11 = scalar_lea.sflag [#allocation7], %s216_s27 }
  0x69   : > { %s1112_s25 = scalar_lea.vmem [#allocation6], %s515_s8 }
  0x6a   : > { %844 = dma.done.wait (%p1272_p1), %s217_s11, 4096  }
  0x6b   : > { %846 = vsyncadd (%p1272_p1), %s217_s11, 4294963200  ;;  %s243_s12 = sand.u32 1, %s857_s13   ;;  %p247_p5 = scmp.lt.s32.totalorder %s881_s19, 1 }
  0x6c   : > { %s1122_s20 = sshll.u32 %s243_s12, 3  ;;  %p517_p4 = scmp.ne.s32.totalorder %s877_s18, 0 }
  0x6d   : > { %s1125_s26 = scalar_select %p247_p5, %s881_s19, 1 }
  0x6e   : > { %s245_s23 = scalar_lea.vmem [#allocation8], %s1122_s20  ;;  %253 = sbr.rel (%p517_p4) target bundleno = 117 (0x75), region = 44  ;;  %v900_v0 = vmov (!%p517_p4), 0.0  }
  0x6f   : > { %s249_s10 = scalar_lea.vmem %s1239_s2, %s1125_s26  ;;  %254 = vst [vmem:[#allocation2] sm:$0xff] (!%p517_p4), %v900_v0 }
  0x75 PF: > { %v271_v1 = vld [vmem:[%s1112_s25 + $0x80] sm:$0xff]  ;;  %v272_v2 = vld [vmem:[%s1112_s25 + $0x88] sm:$0xff]  ;;  %v273_v6 = vld [vmem:[%s1112_s25 + $0x90] sm:$0xff]  ;;  %p518_p2 = scmp.ne.s32.totalorder %s877_s18, 1 }
  0x76   : > { %v255_v3 = vld [vmem:[%s1112_s25] sm:$0xff]  ;;  %v560_v4 = vpack.c.bf16 %v272_v2, %v271_v1  ;;  %v256_v5 = vld [vmem:[%s1112_s25 + $0x8] sm:$0xff]  ;;  %v274_v7 = vld [vmem:[%s1112_s25 + $0x98] sm:$0xff] }
  0x77   : > { %v562_v8 = vpack.c.bf16 %v256_v5, %v255_v3  ;;  %v564_v9 = vpack.c.bf16 %v274_v7, %v273_v6  ;;  %v257_v10 = vld [vmem:[%s1112_s25 + $0x10] sm:$0xff]  ;;  %v258_v11 = vld [vmem:[%s1112_s25 + $0x18] sm:$0xff]  ;;  %v275_v12 = vld [vmem:[%s1112_s25 + $0xa0] sm:$0xff] }
  0x78   : > { %561 = vmatprep.subr.bf16.mxu0 %v560_v4  ;;  %v276_v13 = vld [vmem:[%s1112_s25 + $0xa8] sm:$0xff]  ;;  %v566_v14 = vpack.c.bf16 %v258_v11, %v257_v10  ;;  %v259_v16 = vld [vmem:[%s1112_s25 + $0x20] sm:$0xff]  ;;  %v277_v18 = vld [vmem:[%s1112_s25 + $0xb0] sm:$0xff] }
  0x79   : > { %563 = vmatpush3.bf16.msra.mxu0 %v562_v8  ;;  %v568_v15 = vpack.c.bf16 %v276_v13, %v275_v12  ;;  %v260_v17 = vld [vmem:[%s1112_s25 + $0x28] sm:$0xff]  ;;  %v278_v19 = vld [vmem:[%s1112_s25 + $0xb8] sm:$0xff]  ;;  %v261_v22 = vld [vmem:[%s1112_s25 + $0x30] sm:$0xff] }
  0x7a   : > { %565 = vmatprep.subr.bf16.mxu0 %v564_v9  ;;  %v570_v20 = vpack.c.bf16 %v260_v17, %v259_v16  ;;  %v572_v21 = vpack.c.bf16 %v278_v19, %v277_v18  ;;  %v262_v23 = vld [vmem:[%s1112_s25 + $0x38] sm:$0xff]  ;;  %v279_v24 = vld [vmem:[%s1112_s25 + $0xc0] sm:$0xff]  ;;  %v280_v25 = vld [vmem:[%s1112_s25 + $0xc8] sm:$0xff] }
  0x7b   : > { %v289_v26 = vld [vmem:[#allocation3 + $0x8] sm:$0xff]  ;;  %v574_v27 = vpack.c.bf16 %v262_v23, %v261_v22  ;;  %v576_v28 = vpack.c.bf16 %v280_v25, %v279_v24  ;;  %v263_v29 = vld [vmem:[%s1112_s25 + $0x40] sm:$0xff]  ;;  %v264_v30 = vld [vmem:[%s1112_s25 + $0x48] sm:$0xff] }
  0x7c   : > { %354 = vmatprep.mubr.f32.mxu0 %v289_v26  ;;  %v281_v31 = vld [vmem:[%s1112_s25 + $0xd0] sm:$0xff]  ;;  %v282_v32 = vld [vmem:[%s1112_s25 + $0xd8] sm:$0xff]  ;;  %v578_v33 = vpack.c.bf16 %v264_v30, %v263_v29  ;;  %v283_v37 = vld [vmem:[%s1112_s25 + $0xe0] sm:$0xff] }
  0x7d   : > { %567 = vmatpush3.bf16.msra.mxu0 %v566_v14  ;;  %v580_v34 = vpack.c.bf16 %v282_v32, %v281_v31  ;;  %v265_v35 = vld [vmem:[%s1112_s25 + $0x50] sm:$0xff]  ;;  %v266_v36 = vld [vmem:[%s1112_s25 + $0x58] sm:$0xff]  ;;  %v284_v38 = vld [vmem:[%s1112_s25 + $0xe8] sm:$0xff] }
  0x7e   : > { %569 = vmatprep.subr.bf16.mxu0 %v568_v15  ;;  %v582_v39 = vpack.c.bf16 %v266_v36, %v265_v35  ;;  %v584_v40 = vpack.c.bf16 %v284_v38, %v283_v37  ;;  %v267_v41 = vld [vmem:[%s1112_s25 + $0x60] sm:$0xff]  ;;  %v268_v42 = vld [vmem:[%s1112_s25 + $0x68] sm:$0xff]  ;;  %v285_v43 = vld [vmem:[%s1112_s25 + $0xf0] sm:$0xff] }
  0x7f   : > { %v286_v44 = vld [vmem:[%s1112_s25 + $0xf8] sm:$0xff]  ;;  %v586_v45 = vpack.c.bf16 %v268_v42, %v267_v41  ;;  %v269_v47 = vld [vmem:[%s1112_s25 + $0x70] sm:$0xff]  ;;  %v287_v52 = vld [vmem:[#allocation2] sm:$0xff] }
  0x80   : > { %v588_v46 = vpack.c.bf16 %v286_v44, %v285_v43  ;;  %v270_v48 = vld [vmem:[%s1112_s25 + $0x78] sm:$0xff]  ;;  %v288_v50 = vld [vmem:[#allocation3] sm:$0xff]  ;;  %v519_v57 = vld [vmem:[%s249_s10] ss:$0 sm:$0xff] (!%p518_p2) }
  0x81   : > { %571 = vmatpush3.bf16.msra.mxu0 %v570_v20  ;;  %v590_v49 = vpack.c.bf16 %v270_v48, %v269_v47 }
  0x82   : > { %573 = vmatprep.subr.bf16.mxu0 %v572_v21 }
  0x85   : > { %575 = vmatpush3.bf16.msra.mxu0 %v574_v27 }
  0x86   : > { %577 = vmatprep.subr.bf16.mxu0 %v576_v28 }
  0x89   : > { %579 = vmatpush3.bf16.msra.mxu0 %v578_v33 }
  0x8a   : > { %581 = vmatprep.subr.bf16.mxu0 %v580_v34 }
  0x8d   : > { %583 = vmatpush3.bf16.msra.mxu0 %v582_v39 }
  0x8e   : > { %585 = vmatprep.subr.bf16.mxu0 %v584_v40 }
  0x91   : > { %587 = vmatpush3.bf16.msra.mxu0 %v586_v45 }
  0x92   : > { %589 = vmatprep.subr.bf16.mxu0 %v588_v46 }
  0x95   : > { %591 = vmatpush3.bf16.msra.mxu0 %v590_v49 }
  0x98   : > { %355 = vmatmul.mubr.f32.vlgmr.msra.gmra.mrb[0].mxu0 %v288_v50 }
 0x16b   : > { %v557_v51 = vpop.f32.mrb[0].mxu0  ;;  %365 = sbr.rel (%p518_p2) target bundleno = 382 (0x17e), region = 48 }
 0x16c   : > { %v558_v53 = vpop.f32.mrb[1].mxu0 }
 0x16d   : > { %v559_v54 = vadd.f32 %v558_v53, %v557_v51 }
 0x16f   : > { %v360_v55 = vadd.f32 %v559_v54, %v287_v52 }
 0x171   : > { %361 = vst [vmem:[#allocation2] sm:$0xff] %v360_v55 }
 0x178   : > { %v366_v56 = vld [vmem:[#allocation2] sm:$0xff] }
 0x179   : > { %v367_v58 = vmul.f32 0.25, %v366_v56 }
 0x17b   : > { %v375_v59 = vadd.f32 %v519_v57, %v367_v58 }
 0x17d   : > { %376 = vst [vmem:[%s245_s23] sm:$0xff] %v375_v59 }
 0x17e PF: > { %s521_s24 = sshll.u32 %s881_s19, 7  ;;  %s393_s4 = sshll.u32 %s245_s23, 4  ;;  %s394_s4 = int_to_ptr.vmem [resolvable:$true] %s393_s4 }
 0x17f   : > { %s1177_s0 = scalar_lea.hbm %s1240_s3, %s521_s24  ;;  %s378_s27 = scalar_lea.sflag [#allocation5], %s243_s12 }
 0x180   : > { %s767_s8 = scalar_lea.vmem %s394_s4, 128  ;;  %p1273_p3 = scmp.ne.s32.totalorder %s1258_s30, 0 }
 0x181   : > { %p768_p12 = scmp.ne.s32.totalorder %s394_s4, %s767_s8  ;;  %s901_s11 = smov [#allocation8]  }
 0x182   : > { %s771_s25 = sshll.u32 %s901_s11, 4  ;;  %s772_s25 = int_to_ptr.vmem [resolvable:$false] %s771_s25 }
 0x183   : > { %p769_p6 = pnand %p768_p12, %p1273_p3  ;;  %s773_s26 = scalar_lea.vmem %s772_s25, 256 }
 0x184   : > { %p774_p0 = scmp.lt.s32.totalorder %s394_s4, %s772_s25  ;;  %p775_p8 = scmp.lt.s32.totalorder %s773_s26, %s767_s8 }
 0x185   : > { %p770_p10 = pneg %p769_p6 }
 0x186   : > { %p776_p11 = por %p775_p8, %p774_p0 }
 0x188   : > { %p777_p13 = pnand %p776_p11, %p770_p10 }
 0x18a   : > { %780 = shalt.err (!%p777_p13)
}
 0x18b   : > { %s781_s19 = scalar_lea.hbm %s1177_s0, 128  ;;  %s785_s5 = scalar_lea.hbm %s1240_s3, 256 }
 0x18c   : > { %p782_p7 = scmp.ne.s32.totalorder %s1177_s0, %s781_s19  ;;  %p786_p5 = scmp.lt.u32.totalorder %s1177_s0, %s1240_s3 }
 0x18d   : > { %p787_p4 = scmp.lt.u32.totalorder %s785_s5, %s781_s19  ;;  %p789_p12 = scmp.lt.u32.totalorder %s781_s19, %s1177_s0 }
 0x18e   : > { %p783_p9 = pnand %p782_p7, %p1273_p3 }
 0x18f   : > { %p788_p2 = por %p787_p4, %p786_p5 }
 0x190   : > { %p784_p1 = pneg %p783_p9 }
 0x191   : > { %p790_p6 = por %p789_p12, %p788_p2 }
 0x193   : > { %p791_p10 = pnand %p790_p6, %p784_p1 }
 0x195   : > { %794 = shalt.err (!%p791_p10)
}
 0x196   : > { %598 = dma.vmem_to_hbm [thread:$0]  (%p1273_p3), %s394_s4, 128, %s1177_s0, %s378_s27  }
 0x197 PF: > { %s1274_s23 = sld [smem:[#allocation12_spill]]  ;;  %s1275_s29 = sld [smem:[#allocation14_spill]] }
 0x198   : > { %p615_p0 = scmp.ge.s32.totalorder %s893_s22, 2 }
 0x19d   : > { %s405_s6 = sand.u32 1, %s1274_s23   ;;  %p1276_p8 = scmp.ne.s32.totalorder %s1275_s29, 0 }
 0x19e   : > { %s406_s24 = scalar_lea.sflag [#allocation5], %s405_s6 }
 0x19f   : > { %p609_p11 = pnand %p615_p0, %p1276_p8 }
 0x1a1   : > { %848 = dma.done.wait (!%p609_p11), %s406_s24, 128  }
 0x1a2   : > { %850 = vsyncadd (!%p609_p11), %s406_s24, 4294967168  ;;  %s20_s22 = sadd.s32 1, %s893_s22   ;;  %s1277_s18 = sld [smem:[#allocation13_spill]] }
 0x1a3   : > { %p17_p13 = scmp.ge.s32.totalorder %s20_s22, 6   ;;  %s1278_s20 = sld [smem:[#allocation15_spill]] }
 0x1a4   : > { %s1279_s30 = sld [smem:[#allocation16_spill]]  ;;  %s1280_s12 = smov %s857_s13 }
 0x1a5   : > { %s1281_s13 = smov %s861_s14  ;;  %s1282_s14 = smov %s1070_s7 }
 0x1a6   : > { %s1283_s15 = smov %s869_s16  ;;  %s1284_s16 = smov %s873_s17 }
 0x1a7   : > { %s1285_s17 = smov %s1075_s28  ;;  %s1286_s19 = smov %s889_s21 }
 0x1a8   :  { %19 = sbr.rel (!%p17_p13) target bundleno = 12 (0xc), region = 94 }
 0x1aa   : > { %s1287_s21 = smov %s1279_s30 }
 0x1af   :  { %411 = vsyncpa [#allocation4], 1 }
 0x1b0   :  { %413 = vsyncpa [#allocation4 + $0x1], 1 }
 0x1b1   :  { %414 = vsyncpa [#allocation7], 1 }
 0x1b2   :  { %416 = vsyncpa [#allocation7 + $0x1], 1 }
 0x1b3   :  { %417 = vsyncpa [#allocation5], 1 }
 0x1b4   :  { %419 = vsyncpa [#allocation5 + $0x1], 1 }

</bundles_post_ra>
